<compile_context>
chip_gen: v7x
topology: tpu7x:2x2x1
jax: 0.10.0
libtpu: 0.0.40
codegen_flags: <defaults>
</compile_context>

<pallas_src>
import functools

import jax
import jax.numpy as jnp
from jax.experimental import pallas as pl
from jax.experimental.pallas import tpu as pltpu

BN_EPS = 1e-5


def channel_cnn_kernel(x_ref, w1_ref, w2_ref, w3_ref, pp_ref, o_ref,
                       h1_ref, h2_ref, *, k_size, l1, l2, l3, half):
    """Fused Conv1d x3 + BatchNorm1d x2 + length-mean.

    x_ref  : (B, L0, Cin)   input in NLC layout (transposed in the wrapper)
    w*_ref : (K, Ci, Co)    per-tap conv weights
    pp_ref : (4, F)         rows = [gamma1 (zero-padded), gamma2, beta2, b3]
    o_ref  : (B, F)
    h1_ref : (B, L1, half)  VMEM scratch (BN1-scaled layer-1 activation)
    h2_ref : (B, L2, F)     VMEM scratch (raw layer-2 activation)
    """

    def conv_taps(src_ref, w_ref, l_out):
        # K-tap accumulation; each tap is a static Ref slice (no value concat,
        # no lane relayout).  'blc,co->blo' has no batch dims: B and l_out are
        # free dims of a single contraction (lowered as B*l_out MXU rows).
        acc = jnp.einsum("blc,co->blo", src_ref[:, 0:l_out, :], w_ref[0],
                         preferred_element_type=jnp.float32)
        for k in range(1, k_size):
            acc = acc + jnp.einsum("blc,co->blo", src_ref[:, k:k + l_out, :],
                                   w_ref[k], preferred_element_type=jnp.float32)
        return acc

    def stats(h):
        # Biased batch statistics over (B, L) per channel; clamp the
        # E[x^2]-E[x]^2 form against negative f32 cancellation.
        mu = jnp.mean(h, axis=(0, 1))                                  # (C,)
        var = jnp.maximum(jnp.mean(h * h, axis=(0, 1)) - mu * mu, 0.0)
        return mu, var

    # ---- Layer 1: conv1 (b1 dropped - constant before the BN1->BN2 chain) ----
    h1 = conv_taps(x_ref, w1_ref, l1)                                  # (B, L1, half)
    _, var1 = stats(h1)
    scale1 = pp_ref[0, 0:half] * jax.lax.rsqrt(var1 + BN_EPS)          # (half,)
    # beta1 / mean1 produce a per-channel constant in front of BN2 and are
    # cancelled exactly by BN2's mean subtraction -> only the scale survives.
    h1_ref[...] = h1 * scale1

    # ---- Layer 2: conv2 (b2 dropped), taps read from the VMEM scratch ----
    h2 = conv_taps(h1_ref, w2_ref, l2)                                 # (B, L2, F)
    mu2, var2 = stats(h2)
    scale2 = pp_ref[1, :] * jax.lax.rsqrt(var2 + BN_EPS)               # (F,)
    shift2 = pp_ref[2, :] - mu2 * scale2                               # (F,)
    h2_ref[...] = h2

    # ---- Layer 3 + length mean, mean hoisted before the matmul ----
    acc = None
    for k in range(k_size):
        m_k = jnp.mean(h2_ref[:, k:k + l3, :], axis=1)                 # (B, F)
        y = jnp.dot(m_k * scale2 + shift2, w3_ref[k],
                    preferred_element_type=jnp.float32)                # (B, F)
        acc = y if acc is None else acc + y
    o_ref[...] = (acc + pp_ref[3, :]).astype(o_ref.dtype)


def channel_cnn_forward(x, params):
    """x: (bsz, ch_num, emb_dim) float32 in PyTorch NCL layout."""
    bsz, ch_num, emb_dim = x.shape
    if ch_num == 1:
        # Pass-through branch: pure glue, no compute worth a kernel.
        return jnp.squeeze(x, axis=1)

    (w1, b1, g1, be1, w2, b2, g2, be2, w3, b3) = params
    del b1, b2, be1  # mathematically inert in front of training-mode BatchNorm
    half, cin, k_size = w1.shape
    final_dim = w3.shape[0]
    l1 = emb_dim - (k_size - 1)
    l2 = l1 - (k_size - 1)
    l3 = l2 - (k_size - 1)
    assert l3 >= 1, "emb_dim too small for three valid convolutions"

    # Kernel reads x directly in (B, L, Cin) lane-contiguous layout; no im2col
    # inflation in HBM.
    x_nlc = jnp.transpose(x, (0, 2, 1)).astype(jnp.float32)            # (B, L0, Cin)

    # Conv weights (Co, Ci, K) -> per-tap (K, Ci, Co) for the tap matmuls.
    to_taps = lambda w: jnp.transpose(w, (2, 1, 0)).astype(jnp.float32)
    w1_t, w2_t, w3_t = to_taps(w1), to_taps(w2), to_taps(w3)

    # Pack all surviving per-channel vectors into a single (4, final_dim) operand.
    pad = lambda v: jnp.pad(v.astype(jnp.float32), (0, final_dim - v.shape[0]))
    packed = jnp.stack([pad(g1), g2.astype(jnp.float32),
                        be2.astype(jnp.float32), b3.astype(jnp.float32)], axis=0)

    # Advisory cost estimate for XLA's scheduler (layer 3 is post-mean: B rows).
    flops = 2 * bsz * (l1 * k_size * cin * half
                       + l2 * k_size * half * final_dim
                       + k_size * final_dim * final_dim)
    bytes_accessed = 4 * (bsz * emb_dim * cin
                          + k_size * (cin * half + half * final_dim
                                      + final_dim * final_dim)
                          + 4 * final_dim + bsz * final_dim)

    vmem = pl.BlockSpec(memory_space=pltpu.MemorySpace.VMEM)
    kernel = functools.partial(channel_cnn_kernel, k_size=k_size,
                               l1=l1, l2=l2, l3=l3, half=half)
    # NOTE: on v6e/v7x, casting MXU operands to bf16 (f32 accumulation, f32 BN
    # statistics/rsqrt) would halve DMA/VMEM traffic; kept f32 here to preserve
    # the 1e-4 parity with the reference.
    return pl.pallas_call(
        kernel,
        out_shape=jax.ShapeDtypeStruct((bsz, final_dim), jnp.float32),
        in_specs=[vmem] * 5,
        out_specs=vmem,
        scratch_shapes=[pltpu.VMEM((bsz, l1, half), jnp.float32),
                        pltpu.VMEM((bsz, l2, final_dim), jnp.float32)],
        compiler_params=pltpu.CompilerParams(vmem_limit_bytes=32 * 1024 * 1024),
        cost_estimate=pl.CostEstimate(flops=flops,
                                      transcendentals=half + final_dim,
                                      bytes_accessed=bytes_accessed),
    )(x_nlc, w1_t, w2_t, w3_t, packed)


def init_params(key, cnn_in_channels, final_dim, kernel_size):
    half = final_dim // 2
    ks = jax.random.split(key, 6)
    w1 = 0.1 * jax.random.normal(ks[0], (half, cnn_in_channels, kernel_size), jnp.float32)
    b1 = 0.1 * jax.random.normal(ks[1], (half,), jnp.float32)
    g1 = jnp.ones((half,), jnp.float32)
    be1 = jnp.zeros((half,), jnp.float32)
    w2 = 0.1 * jax.random.normal(ks[2], (final_dim, half, kernel_size), jnp.float32)
    b2 = 0.1 * jax.random.normal(ks[3], (final_dim,), jnp.float32)
    g2 = jnp.ones((final_dim,), jnp.float32)
    be2 = jnp.zeros((final_dim,), jnp.float32)
    w3 = 0.1 * jax.random.normal(ks[4], (final_dim, final_dim, kernel_size), jnp.float32)
    b3 = 0.1 * jax.random.normal(ks[5], (final_dim,), jnp.float32)
    return (w1, b1, g1, be1, w2, b2, g2, be2, w3, b3)


def reference_forward(x, params):
    """Pure-JAX reference (no Pallas, all biases included) for a correctness check."""
    (w1, b1, g1, be1, w2, b2, g2, be2, w3, b3) = params

    def conv(x_ncl, w, b):  # x: (B, Ci, L), w: (Co, Ci, K)
        y = jax.lax.conv_general_dilated(
            x_ncl, w, window_strides=(1,), padding="VALID",
            dimension_numbers=("NCH", "OIH", "NCH"))
        return y + b[None, :, None]

    def bn(x_ncl, g, be):
        mean = jnp.mean(x_ncl, axis=(0, 2), keepdims=True)
        var = jnp.mean((x_ncl - mean) ** 2, axis=(0, 2), keepdims=True)
        return (x_ncl - mean) / jnp.sqrt(var + BN_EPS) * g[None, :, None] + be[None, :, None]

    h = conv(x, w1, b1)
    h = bn(h, g1, be1)
    h = conv(h, w2, b2)
    h = bn(h, g2, be2)
    h = conv(h, w3, b3)
    return jnp.mean(h, axis=-1)


if __name__ == "__main__":
    # args: cnn_in_channels=4, final_dim=32, cnn_kernel_size=3; input emb_dim=16, batch=2.
    bsz, cnn_in_channels, emb_dim = 2, 4, 16
    final_dim, kernel_size = 32, 3

    key = jax.random.PRNGKey(0)
    kx, kp = jax.random.split(key)
    x = jax.random.normal(kx, (bsz, cnn_in_channels, emb_dim), jnp.float32)
    params = init_params(kp, cnn_in_channels, final_dim, kernel_size)

    out = jax.jit(channel_cnn_forward)(x, params)
    out = jax.block_until_ready(out)

    ref = reference_forward(x, params)
    assert out.shape == (bsz, final_dim), out.shape
    assert jnp.allclose(out, ref, atol=1e-4, rtol=1e-4), float(jnp.max(jnp.abs(out - ref)))

    # ch_num == 1 branch (identity squeeze, handled as glue).
    x1 = jax.random.normal(kx, (bsz, 1, emb_dim), jnp.float32)
    out1 = jax.block_until_ready(channel_cnn_forward(x1, params))
    assert out1.shape == (bsz, emb_dim)

    print("KERNEL_OK")
</pallas_src>

<mosaic_0001>
module attributes {stable_mosaic.version = 11 : i64} {
  func.func @channel_cnn_kernel(%arg0: memref<2x16x4xf32, #tpu.memory_space<vmem>>, %arg1: memref<3x4x16xf32, #tpu.memory_space<vmem>>, %arg2: memref<3x16x32xf32, #tpu.memory_space<vmem>>, %arg3: memref<3x32x32xf32, #tpu.memory_space<vmem>>, %arg4: memref<4x32xf32, #tpu.memory_space<vmem>>, %arg5: memref<2x32xf32, #tpu.memory_space<vmem>>, %arg6: memref<2x14x16xf32, #tpu.memory_space<vmem>>, %arg7: memref<2x12x32xf32, #tpu.memory_space<vmem>>) attributes {dimension_semantics = [], scalar_prefetch = 0 : i64, scratch_operands = 2 : i64, tpu.core_type = #tpu.core_type<tc>} {
    %c0 = arith.constant 0 : index
    %c0_0 = arith.constant 0 : index
    %c0_1 = arith.constant 0 : index
    %0 = vector.load %arg0[%c0, %c0_0, %c0_1] : memref<2x16x4xf32, #tpu.memory_space<vmem>>, vector<2x14x4xf32>
    %c0_2 = arith.constant 0 : index
    %c0_3 = arith.constant 0 : index
    %c0_4 = arith.constant 0 : index
    %1 = vector.load %arg1[%c0_2, %c0_3, %c0_4] : memref<3x4x16xf32, #tpu.memory_space<vmem>>, vector<1x4x16xf32>
    %2 = vector.shape_cast %1 : vector<1x4x16xf32> to vector<4x16xf32>
    "tpu.trace_start"() <{level = 10 : i32, message = "blc,co->blo"}> : () -> ()
    %cst = arith.constant dense<0.000000e+00> : vector<2x14x16xf32>
    %3 = tpu.matmul %0, %2, %cst {dimension_numbers = #tpu.dot_dimension_numbers<[2], [0], [0, 1], [1], [0, 0, 0, 1, 1, 1], [], []>} : vector<2x14x4xf32>, vector<4x16xf32>, vector<2x14x16xf32> -> vector<2x14x16xf32>
    "tpu.trace_stop"() : () -> ()
    %c0_5 = arith.constant 0 : index
    %c1 = arith.constant 1 : index
    %c0_6 = arith.constant 0 : index
    %4 = vector.load %arg0[%c0_5, %c1, %c0_6] : memref<2x16x4xf32, #tpu.memory_space<vmem>>, vector<2x14x4xf32>
    %c1_7 = arith.constant 1 : index
    %c0_8 = arith.constant 0 : index
    %c0_9 = arith.constant 0 : index
    %5 = vector.load %arg1[%c1_7, %c0_8, %c0_9] : memref<3x4x16xf32, #tpu.memory_space<vmem>>, vector<1x4x16xf32>
    %6 = vector.shape_cast %5 : vector<1x4x16xf32> to vector<4x16xf32>
    "tpu.trace_start"() <{level = 10 : i32, message = "blc,co->blo"}> : () -> ()
    %cst_10 = arith.constant dense<0.000000e+00> : vector<2x14x16xf32>
    %7 = tpu.matmul %4, %6, %cst_10 {dimension_numbers = #tpu.dot_dimension_numbers<[2], [0], [0, 1], [1], [0, 0, 0, 1, 1, 1], [], []>} : vector<2x14x4xf32>, vector<4x16xf32>, vector<2x14x16xf32> -> vector<2x14x16xf32>
    "tpu.trace_stop"() : () -> ()
    %8 = arith.addf %3, %7 : vector<2x14x16xf32>
    %c0_11 = arith.constant 0 : index
    %c2 = arith.constant 2 : index
    %c0_12 = arith.constant 0 : index
    %9 = vector.load %arg0[%c0_11, %c2, %c0_12] : memref<2x16x4xf32, #tpu.memory_space<vmem>>, vector<2x14x4xf32>
    %c2_13 = arith.constant 2 : index
    %c0_14 = arith.constant 0 : index
    %c0_15 = arith.constant 0 : index
    %10 = vector.load %arg1[%c2_13, %c0_14, %c0_15] : memref<3x4x16xf32, #tpu.memory_space<vmem>>, vector<1x4x16xf32>
    %11 = vector.shape_cast %10 : vector<1x4x16xf32> to vector<4x16xf32>
    "tpu.trace_start"() <{level = 10 : i32, message = "blc,co->blo"}> : () -> ()
    %cst_16 = arith.constant dense<0.000000e+00> : vector<2x14x16xf32>
    %12 = tpu.matmul %9, %11, %cst_16 {dimension_numbers = #tpu.dot_dimension_numbers<[2], [0], [0, 1], [1], [0, 0, 0, 1, 1, 1], [], []>} : vector<2x14x4xf32>, vector<4x16xf32>, vector<2x14x16xf32> -> vector<2x14x16xf32>
    "tpu.trace_stop"() : () -> ()
    %13 = arith.addf %8, %12 : vector<2x14x16xf32>
    %cst_17 = arith.constant dense<0.000000e+00> : vector<16xf32>
    %14 = vector.multi_reduction <add>, %13, %cst_17 [0, 1] : vector<2x14x16xf32> to vector<16xf32>
    %cst_18 = arith.constant 2.800000e+01 : f32
    %15 = vector.broadcast %cst_18 : f32 to vector<16xf32>
    %16 = arith.divf %14, %15 : vector<16xf32>
    %17 = arith.mulf %13, %13 : vector<2x14x16xf32>
    %cst_19 = arith.constant dense<0.000000e+00> : vector<16xf32>
    %18 = vector.multi_reduction <add>, %17, %cst_19 [0, 1] : vector<2x14x16xf32> to vector<16xf32>
    %cst_20 = arith.constant 2.800000e+01 : f32
    %19 = vector.broadcast %cst_20 : f32 to vector<16xf32>
    %20 = arith.divf %18, %19 : vector<16xf32>
    %21 = arith.mulf %16, %16 : vector<16xf32>
    %22 = arith.subf %20, %21 : vector<16xf32>
    %cst_21 = arith.constant 0.000000e+00 : f32
    %23 = vector.broadcast %cst_21 : f32 to vector<16xf32>
    %24 = arith.maximumf %22, %23 : vector<16xf32>
    %c0_22 = arith.constant 0 : index
    %c0_23 = arith.constant 0 : index
    %25 = vector.load %arg4[%c0_22, %c0_23] : memref<4x32xf32, #tpu.memory_space<vmem>>, vector<1x16xf32>
    %26 = vector.shape_cast %25 : vector<1x16xf32> to vector<16xf32>
    %cst_24 = arith.constant 9.99999974E-6 : f32
    %27 = vector.broadcast %cst_24 : f32 to vector<16xf32>
    %28 = arith.addf %24, %27 : vector<16xf32>
    %29 = math.rsqrt %28 : vector<16xf32>
    %30 = arith.mulf %26, %29 : vector<16xf32>
    %31 = vector.shape_cast %30 : vector<16xf32> to vector<1x1x16xf32>
    %32 = vector.broadcast %31 : vector<1x1x16xf32> to vector<2x14x16xf32>
    %33 = arith.mulf %13, %32 : vector<2x14x16xf32>
    %c0_25 = arith.constant 0 : index
    %c0_26 = arith.constant 0 : index
    %c0_27 = arith.constant 0 : index
    %34 = vector.load %arg6[%c0_25, %c0_26, %c0_27] : memref<2x14x16xf32, #tpu.memory_space<vmem>>, vector<2x14x16xf32>
    tpu.vector_store %arg6[%c0_25, %c0_26, %c0_27], %33 {strides = array<i32>} : memref<2x14x16xf32, #tpu.memory_space<vmem>>, vector<2x14x16xf32>,
    %c0_28 = arith.constant 0 : index
    %c0_29 = arith.constant 0 : index
    %c0_30 = arith.constant 0 : index
    %35 = vector.load %arg6[%c0_28, %c0_29, %c0_30] : memref<2x14x16xf32, #tpu.memory_space<vmem>>, vector<2x12x16xf32>
    %c0_31 = arith.constant 0 : index
    %c0_32 = arith.constant 0 : index
    %c0_33 = arith.constant 0 : index
    %36 = vector.load %arg2[%c0_31, %c0_32, %c0_33] : memref<3x16x32xf32, #tpu.memory_space<vmem>>, vector<1x16x32xf32>
    %37 = vector.shape_cast %36 : vector<1x16x32xf32> to vector<16x32xf32>
    "tpu.trace_start"() <{level = 10 : i32, message = "blc,co->blo"}> : () -> ()
    %cst_34 = arith.constant dense<0.000000e+00> : vector<2x12x32xf32>
    %38 = tpu.matmul %35, %37, %cst_34 {dimension_numbers = #tpu.dot_dimension_numbers<[2], [0], [0, 1], [1], [0, 0, 0, 1, 1, 1], [], []>} : vector<2x12x16xf32>, vector<16x32xf32>, vector<2x12x32xf32> -> vector<2x12x32xf32>
    "tpu.trace_stop"() : () -> ()
    %c0_35 = arith.constant 0 : index
    %c1_36 = arith.constant 1 : index
    %c0_37 = arith.constant 0 : index
    %39 = vector.load %arg6[%c0_35, %c1_36, %c0_37] : memref<2x14x16xf32, #tpu.memory_space<vmem>>, vector<2x12x16xf32>
    %c1_38 = arith.constant 1 : index
    %c0_39 = arith.constant 0 : index
    %c0_40 = arith.constant 0 : index
    %40 = vector.load %arg2[%c1_38, %c0_39, %c0_40] : memref<3x16x32xf32, #tpu.memory_space<vmem>>, vector<1x16x32xf32>
    %41 = vector.shape_cast %40 : vector<1x16x32xf32> to vector<16x32xf32>
    "tpu.trace_start"() <{level = 10 : i32, message = "blc,co->blo"}> : () -> ()
    %cst_41 = arith.constant dense<0.000000e+00> : vector<2x12x32xf32>
    %42 = tpu.matmul %39, %41, %cst_41 {dimension_numbers = #tpu.dot_dimension_numbers<[2], [0], [0, 1], [1], [0, 0, 0, 1, 1, 1], [], []>} : vector<2x12x16xf32>, vector<16x32xf32>, vector<2x12x32xf32> -> vector<2x12x32xf32>
    "tpu.trace_stop"() : () -> ()
    %43 = arith.addf %38, %42 : vector<2x12x32xf32>
    %c0_42 = arith.constant 0 : index
    %c2_43 = arith.constant 2 : index
    %c0_44 = arith.constant 0 : index
    %44 = vector.load %arg6[%c0_42, %c2_43, %c0_44] : memref<2x14x16xf32, #tpu.memory_space<vmem>>, vector<2x12x16xf32>
    %c2_45 = arith.constant 2 : index
    %c0_46 = arith.constant 0 : index
    %c0_47 = arith.constant 0 : index
    %45 = vector.load %arg2[%c2_45, %c0_46, %c0_47] : memref<3x16x32xf32, #tpu.memory_space<vmem>>, vector<1x16x32xf32>
    %46 = vector.shape_cast %45 : vector<1x16x32xf32> to vector<16x32xf32>
    "tpu.trace_start"() <{level = 10 : i32, message = "blc,co->blo"}> : () -> ()
    %cst_48 = arith.constant dense<0.000000e+00> : vector<2x12x32xf32>
    %47 = tpu.matmul %44, %46, %cst_48 {dimension_numbers = #tpu.dot_dimension_numbers<[2], [0], [0, 1], [1], [0, 0, 0, 1, 1, 1], [], []>} : vector<2x12x16xf32>, vector<16x32xf32>, vector<2x12x32xf32> -> vector<2x12x32xf32>
    "tpu.trace_stop"() : () -> ()
    %48 = arith.addf %43, %47 : vector<2x12x32xf32>
    %cst_49 = arith.constant dense<0.000000e+00> : vector<32xf32>
    %49 = vector.multi_reduction <add>, %48, %cst_49 [0, 1] : vector<2x12x32xf32> to vector<32xf32>
    %cst_50 = arith.constant 2.400000e+01 : f32
    %50 = vector.broadcast %cst_50 : f32 to vector<32xf32>
    %51 = arith.divf %49, %50 : vector<32xf32>
    %52 = arith.mulf %48, %48 : vector<2x12x32xf32>
    %cst_51 = arith.constant dense<0.000000e+00> : vector<32xf32>
    %53 = vector.multi_reduction <add>, %52, %cst_51 [0, 1] : vector<2x12x32xf32> to vector<32xf32>
    %cst_52 = arith.constant 2.400000e+01 : f32
    %54 = vector.broadcast %cst_52 : f32 to vector<32xf32>
    %55 = arith.divf %53, %54 : vector<32xf32>
    %56 = arith.mulf %51, %51 : vector<32xf32>
    %57 = arith.subf %55, %56 : vector<32xf32>
    %cst_53 = arith.constant 0.000000e+00 : f32
    %58 = vector.broadcast %cst_53 : f32 to vector<32xf32>
    %59 = arith.maximumf %57, %58 : vector<32xf32>
    %c1_54 = arith.constant 1 : index
    %c0_55 = arith.constant 0 : index
    %60 = vector.load %arg4[%c1_54, %c0_55] : memref<4x32xf32, #tpu.memory_space<vmem>>, vector<1x32xf32>
    %61 = vector.shape_cast %60 : vector<1x32xf32> to vector<32xf32>
    %cst_56 = arith.constant 9.99999974E-6 : f32
    %62 = vector.broadcast %cst_56 : f32 to vector<32xf32>
    %63 = arith.addf %59, %62 : vector<32xf32>
    %64 = math.rsqrt %63 : vector<32xf32>
    %65 = arith.mulf %61, %64 : vector<32xf32>
    %c2_57 = arith.constant 2 : index
    %c0_58 = arith.constant 0 : index
    %66 = vector.load %arg4[%c2_57, %c0_58] : memref<4x32xf32, #tpu.memory_space<vmem>>, vector<1x32xf32>
    %67 = vector.shape_cast %66 : vector<1x32xf32> to vector<32xf32>
    %68 = arith.mulf %51, %65 : vector<32xf32>
    %69 = arith.subf %67, %68 : vector<32xf32>
    %c0_59 = arith.constant 0 : index
    %c0_60 = arith.constant 0 : index
    %c0_61 = arith.constant 0 : index
    %70 = vector.load %arg7[%c0_59, %c0_60, %c0_61] : memref<2x12x32xf32, #tpu.memory_space<vmem>>, vector<2x12x32xf32>
    tpu.vector_store %arg7[%c0_59, %c0_60, %c0_61], %48 {strides = array<i32>} : memref<2x12x32xf32, #tpu.memory_space<vmem>>, vector<2x12x32xf32>,
    %c0_62 = arith.constant 0 : index
    %c0_63 = arith.constant 0 : index
    %c0_64 = arith.constant 0 : index
    %71 = vector.load %arg7[%c0_62, %c0_63, %c0_64] : memref<2x12x32xf32, #tpu.memory_space<vmem>>, vector<2x10x32xf32>
    %cst_65 = arith.constant dense<0.000000e+00> : vector<2x32xf32>
    %72 = vector.multi_reduction <add>, %71, %cst_65 [1] : vector<2x10x32xf32> to vector<2x32xf32>
    %cst_66 = arith.constant 1.000000e+01 : f32
    %73 = vector.broadcast %cst_66 : f32 to vector<2x32xf32>
    %74 = arith.divf %72, %73 : vector<2x32xf32>
    %75 = vector.shape_cast %65 : vector<32xf32> to vector<1x32xf32>
    %76 = vector.broadcast %75 : vector<1x32xf32> to vector<2x32xf32>
    %77 = arith.mulf %74, %76 : vector<2x32xf32>
    %78 = vector.shape_cast %69 : vector<32xf32> to vector<1x32xf32>
    %79 = vector.broadcast %78 : vector<1x32xf32> to vector<2x32xf32>
    %80 = arith.addf %77, %79 : vector<2x32xf32>
    %c0_67 = arith.constant 0 : index
    %c0_68 = arith.constant 0 : index
    %c0_69 = arith.constant 0 : index
    %81 = vector.load %arg3[%c0_67, %c0_68, %c0_69] : memref<3x32x32xf32, #tpu.memory_space<vmem>>, vector<1x32x32xf32>
    %82 = vector.shape_cast %81 : vector<1x32x32xf32> to vector<32x32xf32>
    %cst_70 = arith.constant dense<0.000000e+00> : vector<2x32xf32>
    %83 = tpu.matmul %80, %82, %cst_70 {dimension_numbers = #tpu.dot_dimension_numbers<[1], [0], [0], [1], [0, 0, 1, 1], [], []>} : vector<2x32xf32>, vector<32x32xf32>, vector<2x32xf32> -> vector<2x32xf32>
    %c0_71 = arith.constant 0 : index
    %c1_72 = arith.constant 1 : index
    %c0_73 = arith.constant 0 : index
    %84 = vector.load %arg7[%c0_71, %c1_72, %c0_73] : memref<2x12x32xf32, #tpu.memory_space<vmem>>, vector<2x10x32xf32>
    %cst_74 = arith.constant dense<0.000000e+00> : vector<2x32xf32>
    %85 = vector.multi_reduction <add>, %84, %cst_74 [1] : vector<2x10x32xf32> to vector<2x32xf32>
    %cst_75 = arith.constant 1.000000e+01 : f32
    %86 = vector.broadcast %cst_75 : f32 to vector<2x32xf32>
    %87 = arith.divf %85, %86 : vector<2x32xf32>
    %88 = vector.shape_cast %65 : vector<32xf32> to vector<1x32xf32>
    %89 = vector.broadcast %88 : vector<1x32xf32> to vector<2x32xf32>
    %90 = arith.mulf %87, %89 : vector<2x32xf32>
    %91 = vector.shape_cast %69 : vector<32xf32> to vector<1x32xf32>
    %92 = vector.broadcast %91 : vector<1x32xf32> to vector<2x32xf32>
    %93 = arith.addf %90, %92 : vector<2x32xf32>
    %c1_76 = arith.constant 1 : index
    %c0_77 = arith.constant 0 : index
    %c0_78 = arith.constant 0 : index
    %94 = vector.load %arg3[%c1_76, %c0_77, %c0_78] : memref<3x32x32xf32, #tpu.memory_space<vmem>>, vector<1x32x32xf32>
    %95 = vector.shape_cast %94 : vector<1x32x32xf32> to vector<32x32xf32>
    %cst_79 = arith.constant dense<0.000000e+00> : vector<2x32xf32>
    %96 = tpu.matmul %93, %95, %cst_79 {dimension_numbers = #tpu.dot_dimension_numbers<[1], [0], [0], [1], [0, 0, 1, 1], [], []>} : vector<2x32xf32>, vector<32x32xf32>, vector<2x32xf32> -> vector<2x32xf32>
    %97 = arith.addf %83, %96 : vector<2x32xf32>
    %c0_80 = arith.constant 0 : index
    %c2_81 = arith.constant 2 : index
    %c0_82 = arith.constant 0 : index
    %98 = vector.load %arg7[%c0_80, %c2_81, %c0_82] : memref<2x12x32xf32, #tpu.memory_space<vmem>>, vector<2x10x32xf32>
    %cst_83 = arith.constant dense<0.000000e+00> : vector<2x32xf32>
    %99 = vector.multi_reduction <add>, %98, %cst_83 [1] : vector<2x10x32xf32> to vector<2x32xf32>
    %cst_84 = arith.constant 1.000000e+01 : f32
    %100 = vector.broadcast %cst_84 : f32 to vector<2x32xf32>
    %101 = arith.divf %99, %100 : vector<2x32xf32>
    %102 = vector.shape_cast %65 : vector<32xf32> to vector<1x32xf32>
    %103 = vector.broadcast %102 : vector<1x32xf32> to vector<2x32xf32>
    %104 = arith.mulf %101, %103 : vector<2x32xf32>
    %105 = vector.shape_cast %69 : vector<32xf32> to vector<1x32xf32>
    %106 = vector.broadcast %105 : vector<1x32xf32> to vector<2x32xf32>
    %107 = arith.addf %104, %106 : vector<2x32xf32>
    %c2_85 = arith.constant 2 : index
    %c0_86 = arith.constant 0 : index
    %c0_87 = arith.constant 0 : index
    %108 = vector.load %arg3[%c2_85, %c0_86, %c0_87] : memref<3x32x32xf32, #tpu.memory_space<vmem>>, vector<1x32x32xf32>
    %109 = vector.shape_cast %108 : vector<1x32x32xf32> to vector<32x32xf32>
    %cst_88 = arith.constant dense<0.000000e+00> : vector<2x32xf32>
    %110 = tpu.matmul %107, %109, %cst_88 {dimension_numbers = #tpu.dot_dimension_numbers<[1], [0], [0], [1], [0, 0, 1, 1], [], []>} : vector<2x32xf32>, vector<32x32xf32>, vector<2x32xf32> -> vector<2x32xf32>
    %111 = arith.addf %97, %110 : vector<2x32xf32>
    %c3 = arith.constant 3 : index
    %c0_89 = arith.constant 0 : index
    %112 = vector.load %arg4[%c3, %c0_89] : memref<4x32xf32, #tpu.memory_space<vmem>>, vector<1x32xf32>
    %113 = vector.shape_cast %112 : vector<1x32xf32> to vector<32xf32>
    %114 = vector.shape_cast %113 : vector<32xf32> to vector<1x32xf32>
    %115 = vector.broadcast %114 : vector<1x32xf32> to vector<2x32xf32>
    %116 = arith.addf %111, %115 : vector<2x32xf32>
    %c0_90 = arith.constant 0 : index
    %c0_91 = arith.constant 0 : index
    %117 = vector.load %arg5[%c0_90, %c0_91] : memref<2x32xf32, #tpu.memory_space<vmem>>, vector<2x32xf32>
    tpu.vector_store %arg5[%c0_90, %c0_91], %116 {strides = array<i32>} : memref<2x32xf32, #tpu.memory_space<vmem>>, vector<2x32xf32>,
    return
  }
}

</mosaic_0001>

<bundles_post_ra>
// kernel: channel_cnn_forward.1
= control target key start
LH: loop header
LB: loop body
LE: loop exit
PB: predicated region body
PF: predicated region fallthrough
CT: control target
= control target key end

     0   :  { %vm170_vm0 = vcmask 1043456   ;;  %v40_v2 = vlaneseq  ;;  %v2260_v3 = vmov 1983009808   ;;  %s2744_s0 = inlined_call_operand.vmem [shape: f32[2,16,4], index: 0, kind: input, shape index: {}]   ;;  %s2745_s1 = inlined_call_operand.vmem [shape: f32[3,4,16], index: 1, kind: input, shape index: {}]   ;;  %s2746_s2 = inlined_call_operand.vmem [shape: f32[3,16,32], index: 2, kind: input, shape index: {}]   ;;  %s2747_s3 = inlined_call_operand.vmem [shape: f32[3,32,32], index: 3, kind: input, shape index: {}]   ;;  %s2748_s4 = inlined_call_operand.vmem [shape: f32[4,32], index: 4, kind: input, shape index: {}]   ;;  %s2749_s5 = inlined_call_operand.hbm [shape: f32[2,32], index: 5, kind: output, shape index: {}]  }
   0x1   :  { %v1986_v0 = vld [vmem:[%s2745_s1 + $0x4] sm:$0xf]  ;;  %v38_v4 = vunpack.c.l.s4 %v2260_v3  ;;  %v2305_v5 = vld [vmem:[%s2745_s1] sm:$0xf]  ;;  %v27_v6 = vld [vmem:[%s2744_s0 + $0x9] sm:$0x3f] }
   0x2   :  { %v26_v1 = vld [vmem:[%s2744_s0 + $0x1] sm:$0xff]  ;;  %2073 = vmatprep.subr.msk.mxu0 %vm170_vm0, %v1986_v0  ;;  %v28_v7 = vld [vmem:[%s2744_s0 + $0x11] sm:$0xff]  ;;  %v2314_v8 = vshrl.u32 %v40_v2, 7  ;;  %v29_v9 = vld [vmem:[%s2744_s0 + $0x19] sm:$0x3f]  ;;  %v53_v14 = vcombine.high %v27_v6, %v27_v6 }
   0x3   :  { %2074 = vmatpush3.msk.msra.mxu0 %vm170_vm0, %v1986_v0  ;;  %v1997_v10 = vld [vmem:[%s2745_s1 + $0x8] sm:$0xf]  ;;  %v36_v12 = vcombine.high %v26_v1, %v26_v1  ;;  %v39_v13 = vunpack.c.0.s8 %v38_v4  ;;  %v21_v15 = vld [vmem:[%s2744_s0] sm:$0xff]  ;;  %v2339_v17 = vld [vmem:[%s2744_s0 + $0x12] sm:$0xff]  ;;  %v69_v18 = vcombine.high %v28_v7, %v28_v7  ;;  %v86_v19 = vcombine.high %v29_v9, %v29_v9 }
   0x4   :  { %v561_v11 = vld [vmem:[%s2744_s0 + $0x2] sm:$0xff]  ;;  %2081 = vmatprep.subr.msk.mxu0 %vm170_vm0, %v2305_v5  ;;  %2089 = vmatprep.subr.msk.mxu1 %vm170_vm0, %v1997_v10  ;;  %v2334_v16 = vld [vmem:[%s2744_s0 + $0xa] sm:$0x3f]  ;;  %v2350_v22 = vld [vmem:[%s2744_s0 + $0x10] sm:$0xff]  ;;  %v263_v25 = vcombine.high %v21_v15, %v21_v15  ;;  %v604_v27 = vcombine.high %v2339_v17, %v2339_v17 }
   0x5   :  { %2090 = vmatpush3.msk.msra.mxu1 %vm170_vm0, %v1997_v10  ;;  %v571_v20 = vcombine.high %v561_v11, %v561_v11  ;;  %v2345_v21 = vld [vmem:[%s2744_s0 + $0x8] sm:$0x3f]  ;;  %v2355_v23 = vld [vmem:[%s2744_s0 + $0x1a] sm:$0x3f]  ;;  %v2358_v24 = vsub.s32 %v39_v13, %v2314_v8  ;;  %v588_v26 = vcombine.high %v2334_v16, %v2334_v16 }
   0x6   :  { %v2367_v28 = vld [vmem:[%s2744_s0 + $0x18] sm:$0x3f] }
   0x7   :  { %10 = vsyncpa [#allocation5], 0  ;;  %vm161_vm1 = vcmask 31744   ;;  %v280_v29 = vcombine.high %v2345_v21, %v2345_v21  ;;  %v296_v30 = vcombine.high %v2350_v22, %v2350_v22  ;;  %v621_v31 = vcombine.high %v2355_v23, %v2355_v23  ;;  %s2264_s10 = smov [#allocation4]  }
   0x8   :  { %v313_v32 = vcombine.high %v2367_v28, %v2367_v28  ;;  %v43_v33 = vrot.slane %v26_v1, %v2358_v24  ;;  %v50_v34 = vrot.slane %v36_v12, %v2358_v24  ;;  %v60_v35 = vrot.slane %v27_v6, %v2358_v24  ;;  %s1978_s11 = sshll.u32 %s2264_s10, 4  ;;  %s1979_s11 = int_to_ptr.vmem [resolvable:$true] %s1978_s11 }
   0x9   :  { %v67_v36 = vrot.slane %v53_v14, %v2358_v24  ;;  %v76_v37 = vrot.slane %v28_v7, %v2358_v24  ;;  %v83_v38 = vrot.slane %v69_v18, %v2358_v24  ;;  %v93_v39 = vrot.slane %v29_v9, %v2358_v24  ;;  %s2236_s12 = scalar_lea.vmem %s1979_s11, 32  ;;  %p2241_p1 = scmp.lt.s32.totalorder %s1979_s11, %s1979_s11 }
   0xa   :  { %v100_v40 = vrot.slane %v86_v19, %v2358_v24  ;;  %v51_v41 = vcombine.high %v43_v33, %v43_v33  ;;  %v52_v42 = vcombine.high %v50_v34, %v50_v34  ;;  %v68_v43 = vcombine.high %v60_v35, %v60_v35  ;;  %p2237_p0 = scmp.ne.s32.totalorder %s1979_s11, %s2236_s12  ;;  %p2242_p2 = scmp.lt.s32.totalorder %s2236_s12, %s2236_s12 }
   0xb   :  { %v578_v44 = vrot.slane %v561_v11, %v2358_v24  ;;  %v120_v45 = vcombine.low %v67_v36, %v76_v37  ;;  %v84_v46 = vcombine.high %v76_v37, %v76_v37  ;;  %v85_v47 = vcombine.high %v83_v38, %v83_v38 }
   0xc   :  { %v101_v48 = vcombine.high %v93_v39, %v93_v39  ;;  %v102_v49 = vcombine.low %v43_v33, %v51_v41  ;;  %v103_v50 = vcombine.low %v50_v34, %v52_v42  ;;  %v119_v51 = vcombine.low %v60_v35, %v68_v43  ;;  %p2243_p3 = por %p2242_p2, %p2241_p1 }
   0xd   :  { %v585_v52 = vrot.slane %v571_v20, %v2358_v24  ;;  %v134_v53 = vrot.slane %v120_v45, %v2358_v24  ;;  %v136_v54 = vcombine.low %v84_v46, %v83_v38  ;;  %v137_v55 = vcombine.low %v85_v47, %v93_v39 }
   0xe   :  { %v153_v56 = vcombine.low %v101_v48, %v100_v40  ;;  %v110_v57 = vrot.slane %v102_v49, %v2358_v24  ;;  %v117_v58 = vrot.slane %v103_v50, %v2358_v24  ;;  %v127_v59 = vrot.slane %v119_v51, %v2358_v24  ;;  %p2244_p4 = pnand %p2243_p3, %p2237_p0 }
   0xf   :  { %v586_v60 = vcombine.high %v578_v44, %v578_v44  ;;  %v144_v61 = vrot.slane %v136_v54, %v2358_v24  ;;  %v151_v62 = vrot.slane %v137_v55, %v2358_v24  ;;  %v587_v0 = vcombine.high %v585_v52, %v585_v52 }
  0x10   :  { %v160_v63 = vrot.slane %v153_v56, %v2358_v24  ;;  %v118_v1 = vcombine.low %v110_v57, %v117_v58  ;;  %v135_v2 = vcombine.low %v127_v59, %v134_v53  ;;  %v270_v4 = vrot.slane %v21_v15, %v2358_v24 }
  0x11   :  { %v637_v3 = vcombine.low %v578_v44, %v586_v60  ;;  %v152_v6 = vcombine.low %v144_v61, %v151_v62  ;;  %v638_v7 = vcombine.low %v585_v52, %v587_v0  ;;  %v277_v9 = vrot.slane %v263_v25, %v2358_v24 }
  0x12   :  { %v595_v10 = vrot.slane %v2334_v16, %v2358_v24  ;;  %2075 = vmatprep.mubr.msk.f32.mxu0 %vm161_vm1, %v118_v1  ;;  %v278_v12 = vcombine.high %v270_v4, %v270_v4  ;;  %v602_v13 = vrot.slane %v588_v26, %v2358_v24  ;;  %v611_v14 = vrot.slane %v2339_v17, %v2358_v24 }
  0x13   :  { %v645_v11 = vrot.slane %v637_v3, %v2358_v24  ;;  %2076 = vmatmul.mubr.msk.f32.vlgmr.msra.gmra.mrb[0].mxu0 %vm161_vm1, %v135_v2  ;;  %v652_v15 = vrot.slane %v638_v7, %v2358_v24  ;;  %v279_v18 = vcombine.high %v277_v9, %v277_v9  ;;  %v287_v20 = vrot.slane %v2345_v21, %v2358_v24  ;;  %v2011_v2 = vld [vmem:[%s2746_s2 + $0x20] sm:$0xff] }
  0x14   :  { %v603_v19 = vcombine.high %v595_v10, %v595_v10  ;;  %2082 = vmatpush3.msk.msra.mxu0 %vm170_vm0, %v2305_v5  ;;  %2078 = vmatprep.mubr.msk.f32.mxu0 %vm161_vm1, %v152_v6  ;;  %v329_v16 = vcombine.low %v270_v4, %v278_v12  ;;  %v655_v25 = vcombine.low %v602_v13, %v611_v14  ;;  %v2261_v3 = vmov 0.0|0.0   ;;  %v2012_v6 = vld [vmem:[%s2746_s2 + $0x28] sm:$0xff] }
  0x15   :  { %v294_v26 = vrot.slane %v280_v29, %v2358_v24  ;;  %v653_v33 = vcombine.low %v645_v11, %v652_v15  ;;  %v330_v34 = vcombine.low %v277_v9, %v279_v18  ;;  %v295_v36 = vcombine.high %v287_v20, %v287_v20  ;;  %2169 = vmatprep.subr.bf16.mxu1 %v2261_v3 }
  0x16   :  { %v654_v35 = vcombine.low %v595_v10, %v603_v19  ;;  %v337_v37 = vrot.slane %v329_v16, %v2358_v24  ;;  %v669_v38 = vrot.slane %v655_v25, %v2358_v24  ;;  %v303_v21 = vrot.slane %v2350_v22, %v2358_v24  ;;  %2175 = vmatprep.subr.bf16.mxu0 %v2261_v3 }
  0x17   :  { %v618_v5 = vrot.slane %v604_v27, %v2358_v24  ;;  %2079 = vmatmul.mubr.msk.f32.gmra.mrb[2].mxu0 %vm161_vm1, %v160_v63  ;;  %2091 = vmatprep.mubr.msk.f32.mxu1 %vm161_vm1, %v653_v33  ;;  %v344_v29 = vrot.slane %v330_v34, %v2358_v24  ;;  %v346_v40 = vcombine.low %v287_v20, %v295_v36  ;;  %vm2262_vm2 = vmmov 0  }
  0x18   :  { %v662_v39 = vrot.slane %v654_v35, %v2358_v24  ;;  %v347_v41 = vcombine.low %v294_v26, %v303_v21  ;;  %v619_v42 = vcombine.high %v611_v14, %v611_v14  ;;  %v628_v44 = vrot.slane %v2355_v23, %v2358_v24 }
  0x19   :  { %v620_v43 = vcombine.high %v618_v5, %v618_v5  ;;  %v345_v45 = vcombine.low %v337_v37, %v344_v29  ;;  %v354_v17 = vrot.slane %v346_v40, %v2358_v24  ;;  %v310_v27 = vrot.slane %v296_v30, %v2358_v24 }
  0x1a   :  { %v670_v46 = vcombine.low %v662_v39, %v669_v38  ;;  %v361_v47 = vrot.slane %v347_v41, %v2358_v24  ;;  %v671_v48 = vcombine.low %v619_v42, %v618_v5  ;;  %v311_v50 = vcombine.high %v303_v21, %v303_v21 }
  0x1b   :  { %v672_v49 = vcombine.low %v620_v43, %v628_v44  ;;  %2083 = vmatprep.mubr.msk.f32.mxu0 %vm161_vm1, %v345_v45  ;;  %v312_v51 = vcombine.high %v310_v27, %v310_v27  ;;  %v320_v52 = vrot.slane %v2367_v28, %v2358_v24  ;;  %v635_v53 = vrot.slane %v621_v31, %v2358_v24  ;;  %v2003_v28 = vld [vmem:[%s2746_s2 + $0x10] sm:$0xff] }
  0x1c   :  { %2092 = vmatmul.mubr.msk.f32.vlgmr.msra.gmra.mrb[0].mxu1 %vm161_vm1, %v670_v46  ;;  %v362_v22 = vcombine.low %v354_v17, %v361_v47  ;;  %v679_v30 = vrot.slane %v671_v48, %v2358_v24  ;;  %v363_v55 = vcombine.low %v311_v50, %v310_v27  ;;  %v636_v57 = vcombine.high %v628_v44, %v628_v44 }
  0x1d   :  { %v686_v54 = vrot.slane %v672_v49, %v2358_v24  ;;  %v364_v56 = vcombine.low %v312_v51, %v320_v52  ;;  %v327_v58 = vrot.slane %v313_v32, %v2358_v24  ;;  %v328_v59 = vcombine.high %v320_v52, %v320_v52  ;;  %v2004_v32 = vld [vmem:[%s2746_s2 + $0x18] sm:$0xff] }
  0x1e   :  { %2084 = vmatmul.mubr.msk.f32.vlgmr.msra.gmra.mrb[0].mxu0 %vm161_vm1, %v362_v22  ;;  %v371_v23 = vrot.slane %v363_v55, %v2358_v24  ;;  %v688_v61 = vcombine.low %v636_v57, %v635_v53  ;;  %v2170_v4 = vpack.c.bf16 %v2004_v32, %v2003_v28  ;;  %v2176_v7 = vpack.c.bf16 %v2012_v6, %v2011_v2 }
  0x1f   :  { %v687_v60 = vcombine.low %v679_v30, %v686_v54  ;;  %v378_v31 = vrot.slane %v364_v56, %v2358_v24  ;;  %v380_v62 = vcombine.low %v328_v59, %v327_v58  ;;  %v2263_v9 = vmov 0.0  }
  0x20   :  { %v695_v0 = vrot.slane %v688_v61, %v2358_v24  ;;  %2171 = vmatpush3.bf16.msra.mxu1 %v2170_v4  ;;  %2177 = vmatpush3.bf16.msra.mxu0 %v2176_v7  ;;  %vm969_vm3 = vcmask 128000   ;;  %vm967_vm4 = vcmask 130048   ;;  %vm1568_vm5 = vcmask 261120  }
  0x21   :  { %2094 = vmatprep.mubr.msk.f32.mxu1 %vm161_vm1, %v687_v60  ;;  %v379_v63 = vcombine.low %v371_v23, %v378_v31  ;;  %v387_v1 = vrot.slane %v380_v62, %v2358_v24  ;;  %2172 = vmatprep.subr.bf16.mxu1 %v2261_v3  ;;  %vm1570_vm6 = vcmask 257024   ;;  %vm1632_vm7 = vcmask 254976  }
  0x22   :  { %2095 = vmatmul.mubr.msk.f32.gmra.mrb[2].mxu1 %vm161_vm1, %v695_v0  ;;  %2178 = vmatprep.subr.bf16.mxu0 %v2261_v3  ;;  %vm1705_vm8 = vcmask 1041409  }
  0x23   :  { %2086 = vmatprep.mubr.msk.f32.mxu0 %vm161_vm1, %v379_v63  ;;  %2101 = vmatprep.mubr.msk.f32.mxu1 %vm2262_vm2, %v2263_v9 }
  0x24   :  { %2087 = vmatmul.mubr.msk.f32.gmra.mrb[2].mxu0 %vm161_vm1, %v387_v1 }
  0x25   :  { %2127 = vmatprep.mubr.msk.f32.mxu0 %vm2262_vm2, %v2263_v9 }
  0xef   :  { %v2093_v10 = vpop.f32.mrb[0].mxu1 }
  0xf0   :  { %v813_v11 = vcombine.high %v2093_v10, %v2093_v10  ;;  %v820_v12 = vrot.slane %v2093_v10, %v2358_v24  ;;  %v773_v13 = vpop.f32.mrb[1].mxu1 }
  0xf1   :  { %v796_v14 = vcombine.high %v773_v13, %v773_v13  ;;  %v803_v15 = vrot.slane %v773_v13, %v2358_v24  ;;  %v2085_v19 = vpop.f32.mrb[0].mxu0 }
  0xf2   :  { %v827_v18 = vrot.slane %v813_v11, %v2358_v24  ;;  %v828_v20 = vcombine.high %v820_v12, %v820_v12  ;;  %v505_v16 = vcombine.high %v2085_v19, %v2085_v19  ;;  %v512_v25 = vrot.slane %v2085_v19, %v2358_v24  ;;  %v465_v33 = vpop.f32.mrb[1].mxu0 }
  0xf3   :  { %v810_v26 = vrot.slane %v796_v14, %v2358_v24  ;;  %v811_v34 = vcombine.high %v803_v15, %v803_v15  ;;  %v488_v35 = vcombine.high %v465_v33, %v465_v33  ;;  %v495_v36 = vrot.slane %v465_v33, %v2358_v24 }
  0xf4   :  { %v829_v37 = vcombine.high %v827_v18, %v827_v18  ;;  %v519_v38 = vrot.slane %v505_v16, %v2358_v24  ;;  %v520_v21 = vcombine.high %v512_v25, %v512_v25  ;;  %v2481_v5 = vadd.f32 %v820_v12, %v512_v25 }
  0xf5   :  { %v812_v29 = vcombine.high %v810_v26, %v810_v26  ;;  %v502_v39 = vrot.slane %v488_v35, %v2358_v24  ;;  %v503_v40 = vcombine.high %v495_v36, %v495_v36  ;;  %v2484_v41 = vadd.f32 %v803_v15, %v495_v36  ;;  %v2096_v46 = vpop.f32.mrb[2].mxu1 }
  0xf6   :  { %v521_v42 = vcombine.high %v519_v38, %v519_v38  ;;  %v2486_v43 = vadd.f32 %v828_v20, %v520_v21  ;;  %v2488_v44 = vadd.f32 %v827_v18, %v519_v38  ;;  %v988_v45 = vmul.f32 %v2481_v5, %v2481_v5  ;;  %v783_v50 = vpop.f32.mrb[3].mxu1 }
  0xf7   :  { %v504_v17 = vcombine.high %v502_v39, %v502_v39  ;;  %v2492_v27 = vadd.f32 %v811_v34, %v503_v40  ;;  %v2494_v47 = vadd.f32 %v810_v26, %v502_v39  ;;  %v984_v48 = vmul.f32 %v2484_v41, %v2484_v41  ;;  %v2088_v49 = vpop.f32.mrb[2].mxu0 }
  0xf8   :  { %v2498_v51 = vadd.f32 %v829_v37, %v521_v42  ;;  %v914_v52 = vcombine.low %v2481_v5, %v2486_v43  ;;  %v928_v53 = vrot.slane %v2488_v44, %v2358_v24  ;;  %v989_v22 = vmul.f32 %v2486_v43, %v2486_v43  ;;  %v475_v30 = vpop.f32.mrb[3].mxu0 }
  0xf9   :  { %v990_v54 = vmul.f32 %v2488_v44, %v2488_v44  ;;  %v2508_v55 = vadd.f32 %v812_v29, %v504_v17  ;;  %v897_v56 = vcombine.low %v2484_v41, %v2492_v27  ;;  %v985_v57 = vmul.f32 %v2492_v27, %v2492_v27 }
  0xfa   :  { %v921_v58 = vrot.slane %v914_v52, %v2358_v24  ;;  %v1029_v59 = vcombine.low %v988_v45, %v989_v22  ;;  %v986_v60 = vmul.f32 %v2494_v47, %v2494_v47  ;;  %v853_v23 = vrot.slane %v2096_v46, %v2358_v24 }
  0xfb   :  { %v1043_v31 = vrot.slane %v990_v54, %v2358_v24  ;;  %v898_v61 = vcombine.low %v2494_v47, %v2508_v55  ;;  %v905_v62 = vrot.slane %v897_v56, %v2358_v24  ;;  %v987_v63 = vmul.f32 %v2508_v55, %v2508_v55 }
  0xfc   :  { %v929_v0 = vcombine.low %v921_v58, %v928_v53  ;;  %v1036_v1 = vrot.slane %v1029_v59, %v2358_v24  ;;  %v1012_v28 = vcombine.low %v984_v48, %v985_v57  ;;  %v854_v32 = vcombine.high %v853_v23, %v853_v23 }
  0xfd   :  { %v912_v2 = vrot.slane %v898_v61, %v2358_v24  ;;  %v1013_v4 = vcombine.low %v986_v60, %v987_v63  ;;  %v545_v6 = vrot.slane %v2088_v49, %v2358_v24  ;;  %v830_v7 = vcombine.high %v783_v50, %v783_v50 }
  0xfe   :  { %v1044_v10 = vcombine.low %v1036_v1, %v1043_v31  ;;  %v1020_v11 = vrot.slane %v1012_v28, %v2358_v24  ;;  %v837_v12 = vrot.slane %v783_v50, %v2358_v24  ;;  %v970_v19 = vsel %vm969_vm3, %v929_v0, 0.0 }
  0xff   :  { %v913_v13 = vcombine.low %v905_v62, %v912_v2  ;;  %v1027_v14 = vrot.slane %v1013_v4, %v2358_v24  ;;  %v546_v15 = vcombine.high %v545_v6, %v545_v6  ;;  %v2530_v18 = vadd.f32 %v853_v23, %v545_v6 }
 0x100   :  { %v844_v20 = vrot.slane %v830_v7, %v2358_v24  ;;  %v522_v16 = vcombine.high %v475_v30, %v475_v30  ;;  %v845_v34 = vcombine.high %v837_v12, %v837_v12  ;;  %v529_v37 = vrot.slane %v475_v30, %v2358_v24 }
 0x101   :  { %v968_v25 = vsel %vm967_vm4, %v913_v13, 0.0  ;;  %v1028_v26 = vcombine.low %v1020_v11, %v1027_v14  ;;  %v2535_v33 = vadd.f32 %v854_v32, %v546_v15  ;;  %v1083_v21 = vsel %vm969_vm3, %v1044_v10, 0.0 }
 0x102   :  { %v971_v35 = vadd.f32 %v970_v19, %v968_v25  ;;  %v846_v36 = vcombine.high %v844_v20, %v844_v20  ;;  %v536_v38 = vrot.slane %v522_v16, %v2358_v24  ;;  %v537_v40 = vcombine.high %v529_v37, %v529_v37 }
 0x103   :  { %v1082_v29 = vsel %vm967_vm4, %v1028_v26, 0.0  ;;  %v2541_v45 = vadd.f32 %v837_v12, %v529_v37  ;;  %v991_v17 = vmul.f32 %v2498_v51, %v2498_v51  ;;  %v996_v22 = vmul.f32 %v2530_v18, %v2530_v18 }
 0x104   :  { %v1084_v39 = vadd.f32 %v1083_v21, %v1082_v29  ;;  %v538_v42 = vcombine.high %v536_v38, %v536_v38  ;;  %v2543_v46 = vadd.f32 %v844_v20, %v536_v38  ;;  %v2547_v48 = vadd.f32 %v845_v34, %v537_v40 }
 0x105   :  { %v930_v50 = vcombine.low %v2498_v51, %v2541_v45  ;;  %v992_v52 = vmul.f32 %v2541_v45, %v2541_v45  ;;  %v961_v57 = vrot.slane %v2535_v33, %v2358_v24  ;;  %v997_v58 = vmul.f32 %v2535_v33, %v2535_v33 }
 0x106   :  { %v2549_v49 = vadd.f32 %v846_v36, %v538_v42  ;;  %v994_v53 = vmul.f32 %v2543_v46, %v2543_v46  ;;  %v931_v30 = vcombine.low %v2547_v48, %v2543_v46  ;;  %v993_v56 = vmul.f32 %v2547_v48, %v2547_v48 }
 0x107   :  { %v1045_v60 = vcombine.low %v991_v17, %v992_v52  ;;  %v938_v23 = vrot.slane %v930_v50, %v2358_v24  ;;  %v1076_v2 = vrot.slane %v997_v58, %v2358_v24 }
 0x108   :  { %v947_v54 = vcombine.low %v2549_v49, %v2530_v18  ;;  %v995_v59 = vmul.f32 %v2549_v49, %v2549_v49  ;;  %v945_v31 = vrot.slane %v931_v30, %v2358_v24  ;;  %v1046_v62 = vcombine.low %v993_v56, %v994_v53  ;;  %v1099_v30 = vld [vmem:[%s2748_s4] sm:$0x1] }
 0x109   :  { %v1053_v28 = vrot.slane %v1045_v60, %v2358_v24 }
 0x10a   :  { %v954_v61 = vrot.slane %v947_v54, %v2358_v24  ;;  %v1062_v63 = vcombine.low %v995_v59, %v996_v22  ;;  %v946_v0 = vcombine.low %v938_v23, %v945_v31  ;;  %v1060_v32 = vrot.slane %v1046_v62, %v2358_v24 }
 0x10b   :  { %v2586_v54 = vsub.s32 0, %v2314_v8 }
 0x10c   :  { %v962_v1 = vcombine.low %v954_v61, %v961_v57  ;;  %v1069_v4 = vrot.slane %v1062_v63, %v2358_v24  ;;  %v972_v6 = vsel %vm967_vm4, %v946_v0, 0.0  ;;  %v1061_v10 = vcombine.low %v1053_v28, %v1060_v32 }
 0x10d   :  { %v973_v11 = vadd.f32 %v972_v6, %v971_v35 }
 0x10e   :  { %v974_v7 = vsel %vm969_vm3, %v962_v1, 0.0  ;;  %v1077_v12 = vcombine.low %v1069_v4, %v1076_v2  ;;  %v1085_v13 = vsel %vm967_vm4, %v1061_v10, 0.0 }
 0x10f   :  { %v975_v14 = vadd.f32 %v974_v7, %v973_v11  ;;  %v1086_v15 = vadd.f32 %v1085_v13, %v1084_v39 }
 0x110   :  { %v1087_v19 = vsel %vm969_vm3, %v1077_v12, 0.0 }
 0x111   :  { %v976_v20 = vrot.slane %v975_v14, 4  ;;  %v1088_v16 = vadd.f32 %v1087_v19, %v1086_v15 }
 0x113   :  { %v977_v25 = vadd.f32 %v976_v20, %v975_v14  ;;  %v1089_v26 = vrot.slane %v1088_v16, 4  ;;  %v1235_v20 = vld [vmem:[%s2746_s2] sm:$0xff] }
 0x115   :  { %v978_v34 = vrot.slane %v977_v25, 2  ;;  %v1090_v36 = vadd.f32 %v1089_v26, %v1088_v16 }
 0x117   :  { %v979_v37 = vadd.f32 %v978_v34, %v977_v25  ;;  %v1091_v38 = vrot.slane %v1090_v36, 2 }
 0x119   :  { %v980_v21 = vrot.slane %v979_v37, 1  ;;  %v1092_v29 = vadd.f32 %v1091_v38, %v1090_v36 }
 0x11b   :  { %v981_v40 = vadd.f32 %v980_v21, %v979_v37  ;;  %v1093_v42 = vrot.slane %v1092_v29, 1 }
 0x11d   :  { %v983_v35 = vmul.f32 0.035714287, %v981_v40  ;;  %v1094_v17 = vadd.f32 %v1093_v42, %v1092_v29 }
 0x11f   :  { %v1095_v50 = vmul.f32 0.035714287, %v1094_v17  ;;  %v1096_v52 = vmul.f32 %v983_v35, %v983_v35 }
 0x121   :  { %v1097_v53 = vsub.f32 %v1095_v50, %v1096_v52 }
 0x123   :  { %v1098_v39 = vmax.f32 %v1097_v53, 0.0 }
 0x125   :  { %v1100_v22 = vadd.f32 1e-05, %v1098_v39 }
 0x127   :  { %2232 = vrsqrt.f32 %v1100_v22 }
 0x131   :  { %v2233_v56 = vpop.eup %2232 }
 0x132   :  { %v1102_v57 = vmul.f32 %v2233_v56, %v1099_v30 }
 0x134   :  { %v1106_v58 = vrot.slane %v1102_v57, %v2586_v54 }
 0x136   :  { %v1108_v59 = vcombine.high %v1106_v58, %v1106_v58  ;;  %v1115_v60 = vrot.slane %v1106_v58, %v2358_v24 }
 0x138   :  { %v1122_v23 = vrot.slane %v1108_v59, %v2358_v24  ;;  %v1123_v31 = vcombine.high %v1115_v60, %v1115_v60  ;;  %v1129_v61 = vmul.f32 %v1115_v60, %v2484_v41  ;;  %v1133_v62 = vmul.f32 %v1115_v60, %v2481_v5 }
 0x139   :  { %v1136_v63 = vmul.f32 %v1115_v60, %v2498_v51  ;;  %v1140_v0 = vmul.f32 %v1115_v60, %v2549_v49 }
 0x13a   :  { %v1124_v8 = vcombine.high %v1122_v23, %v1122_v23  ;;  %v1130_v1 = vmul.f32 %v1123_v31, %v2492_v27  ;;  %v1131_v28 = vmul.f32 %v1122_v23, %v2494_v47  ;;  %v1134_v32 = vmul.f32 %v1123_v31, %v2486_v43 }
 0x13b   :  { %v1135_v2 = vmul.f32 %v1122_v23, %v2488_v44  ;;  %v1137_v4 = vmul.f32 %v1123_v31, %v2541_v45  ;;  %v1138_v6 = vmul.f32 %v1122_v23, %v2547_v48  ;;  %v1141_v41 = vmul.f32 %v1123_v31, %v2530_v18 }
 0x13c   :  { %v1132_v5 = vmul.f32 %v1124_v8, %v2508_v55  ;;  %v1139_v51 = vmul.f32 %v1124_v8, %v2543_v46  ;;  %v1142_v49 = vmul.f32 %v1122_v23, %v2535_v33  ;;  %v1157_v7 = vcombine.low %v1129_v61, %v1130_v1  ;;  %v1665_v8 = vld [vmem:[%s2747_s3] sm:$0xff] }
 0x13d   :  { %v1174_v27 = vcombine.low %v1133_v62, %v1134_v32  ;;  %v1190_v10 = vcombine.low %v1136_v63, %v1137_v4  ;;  %v1207_v47 = vcombine.low %v1140_v0, %v1141_v41  ;;  %v1188_v45 = vrot.slane %v1135_v2, %v2358_v24  ;;  %v2016_v63 = vld [vmem:[%s2747_s3 + $0x20] sm:$0xff]  ;;  %v2017_v0 = vld [vmem:[%s2747_s3 + $0x28] sm:$0xff]  ;;  %v2018_v32 = vld [vmem:[%s2747_s3 + $0x30] sm:$0xff] }
 0x13e   :  { %v1158_v11 = vcombine.low %v1131_v28, %v1132_v5  ;;  %v1191_v43 = vcombine.low %v1138_v6, %v1139_v51  ;;  %v1221_v18 = vrot.slane %v1142_v49, %v2358_v24  ;;  %v1165_v55 = vrot.slane %v1157_v7, %v2358_v24  ;;  %v1666_v28 = vld [vmem:[%s2747_s3 + $0x8] sm:$0xff]  ;;  %v2019_v2 = vld [vmem:[%s2747_s3 + $0x38] sm:$0xff]  ;;  %v1667_v6 = vld [vmem:[%s2747_s3 + $0x10] sm:$0xff] }
 0x13f   :  { %v1181_v44 = vrot.slane %v1174_v27, %v2358_v24  ;;  %v1214_v48 = vrot.slane %v1207_v47, %v2358_v24  ;;  %v1198_v33 = vrot.slane %v1190_v10, %v2358_v24  ;;  %v2179_v1 = vpack.c.bf16 %v2017_v0, %v2016_v63  ;;  %v1668_v41 = vld [vmem:[%s2747_s3 + $0x18] sm:$0xff] }
 0x140   :  { %v1172_v46 = vrot.slane %v1158_v11, %v2358_v24  ;;  %v1205_v12 = vrot.slane %v1191_v43, %v2358_v24  ;;  %v1236_v24 = vld [vmem:[%s2746_s2 + $0x8] sm:$0xff]  ;;  %v2185_v4 = vpack.c.bf16 %v1666_v28, %v1665_v8  ;;  %v2182_v5 = vpack.c.bf16 %v2019_v2, %v2018_v32 }
 0x141   :  { %v1189_v13 = vcombine.low %v1181_v44, %v1188_v45  ;;  %v1222_v14 = vcombine.low %v1214_v48, %v1221_v18  ;;  %v2173_v36 = vpack.c.bf16 %v1236_v24, %v1235_v20  ;;  %v2188_v51 = vpack.c.bf16 %v1668_v41, %v1667_v6 }
 0x142   :  { %v1173_v15 = vcombine.low %v1165_v55, %v1172_v46  ;;  %v1206_v19 = vcombine.low %v1198_v33, %v1205_v12 }
 0x143   :  { %1228 = vst.msk [vmem:[#allocation2 + $0x8] sm:$0x3f] %vm969_vm3, %v1189_v13  ;;  %1230 = vst.msk [vmem:[#allocation2 + $0x18] sm:$0x3f] %vm969_vm3, %v1222_v14 }
 0x144   :  { %1227 = vst.msk [vmem:[#allocation2] sm:$0xff] %vm967_vm4, %v1173_v15  ;;  %1229 = vst.msk [vmem:[#allocation2 + $0x10] sm:$0xff] %vm967_vm4, %v1206_v19 }
 0x14a   :  { %v1238_v40 = vld [vmem:[#allocation2 + $0x9] sm:$0xf]  ;;  %v1240_v39 = vld [vmem:[#allocation2 + $0x19] sm:$0xf] }
 0x14b   :  { %v1237_v16 = vld [vmem:[#allocation2 + $0x1] sm:$0xff]  ;;  %v1239_v21 = vld [vmem:[#allocation2 + $0x11] sm:$0xff]  ;;  %v1444_v35 = vld [vmem:[#allocation2 + $0xa] sm:$0xf] }
 0x14c   :  { %v1443_v25 = vld [vmem:[#allocation2 + $0x2] sm:$0xff]  ;;  %v1248_v26 = vcombine.high %v1237_v16, %v1237_v16  ;;  %v1445_v29 = vld [vmem:[#allocation2 + $0x12] sm:$0xff]  ;;  %v1251_v42 = vcombine.low %v1238_v40, %v1239_v21  ;;  %v1249_v50 = vcombine.high %v1239_v21, %v1239_v21  ;;  %v1446_v22 = vld [vmem:[#allocation2 + $0x1a] sm:$0xf] }
 0x14d   :  { %v1454_v34 = vcombine.high %v1443_v25, %v1443_v25  ;;  %v1457_v17 = vcombine.low %v1444_v35, %v1445_v29  ;;  %v1455_v52 = vcombine.high %v1445_v29, %v1445_v29  ;;  %v1231_v53 = vld [vmem:[#allocation2] sm:$0xff]  ;;  %v1233_v59 = vld [vmem:[#allocation2 + $0x10] sm:$0xff]  ;;  %v1232_v60 = vld [vmem:[#allocation2 + $0x8] sm:$0xf] }
 0x14e   :  { %v1250_v37 = vcombine.low %v1237_v16, %v1248_v26  ;;  %v1252_v30 = vcombine.low %v1249_v50, %v1240_v39  ;;  %v1343_v57 = vcombine.high %v1231_v53, %v1231_v53  ;;  %v1346_v23 = vcombine.low %v1232_v60, %v1233_v59  ;;  %v1234_v61 = vld [vmem:[#allocation2 + $0x18] sm:$0xf] }
 0x14f   :  { %v1456_v38 = vcombine.low %v1443_v25, %v1454_v34  ;;  %v1458_v56 = vcombine.low %v1455_v52, %v1446_v22  ;;  %v1344_v31 = vcombine.high %v1233_v59, %v1233_v59 }
 0x150   :  { %2102 = vmatmul.mubr.msk.f32.vlgmr.msra.gmra.mrb[4].mxu1 %vm967_vm4, %v1250_v37  ;;  %v1345_v58 = vcombine.low %v1231_v53, %v1343_v57 }
 0x151   :  { %2128 = vmatmul.mubr.msk.f32.vlgmr.msra.gmra.mrb[4].mxu0 %vm967_vm4, %v1456_v38  ;;  %2174 = vmatpush3.bf16.msra.mxu1 %v2173_v36  ;;  %v1347_v62 = vcombine.low %v1344_v31, %v1234_v61 }
 0x152   :  { %2104 = vmatprep.mubr.msk.f32.mxu1 %vm2262_vm2, %v2263_v9  ;;  %2130 = vmatprep.mubr.msk.f32.mxu0 %vm2262_vm2, %v2263_v9 }
 0x153   :  { %2184 = vmatprep.subr.bf16.mxu1 %v2261_v3  ;;  %2180 = vmatpush3.bf16.msra.mxu0 %v2179_v1 }
 0x154   :  { %2105 = vmatmul.mubr.msk.f32.gmra.mrb[6].mxu1 %vm967_vm4, %v1251_v42  ;;  %2181 = vmatprep.subr.bf16.mxu0 %v2261_v3 }
 0x155   :  { %2131 = vmatmul.mubr.msk.f32.gmra.mrb[6].mxu0 %vm967_vm4, %v1457_v17  ;;  %2107 = vmatprep.mubr.msk.f32.mxu1 %vm2262_vm2, %v2263_v9 }
 0x156   :  { %2133 = vmatprep.mubr.msk.f32.mxu0 %vm2262_vm2, %v2263_v9 }
 0x157   :  { %2183 = vmatpush3.bf16.msra.mxu0 %v2182_v5 }
 0x158   :  { %2108 = vmatmul.mubr.msk.f32.gmra.mrb[8].mxu1 %vm967_vm4, %v1252_v30  ;;  %2190 = vmatprep.subr.bf16.mxu0 %v2261_v3 }
 0x159   :  { %2134 = vmatmul.mubr.msk.f32.gmra.mrb[8].mxu0 %vm967_vm4, %v1458_v56  ;;  %2114 = vmatprep.mubr.msk.f32.mxu1 %vm2262_vm2, %v2263_v9 }
 0x15a   :  { %2144 = vmatprep.mubr.msk.f32.mxu0 %vm2262_vm2, %v2263_v9 }
 0x15c   :  { %2115 = vmatmul.mubr.msk.f32.vlgmr.msra.gmra.mrb[4].mxu1 %vm967_vm4, %v1345_v58 }
 0x15d   :  { %2117 = vmatprep.mubr.msk.f32.mxu1 %vm2262_vm2, %v2263_v9  ;;  %2186 = vmatpush3.bf16.msra.mxu1 %v2185_v4 }
 0x15e   :  { %2187 = vmatprep.subr.bf16.mxu1 %v2261_v3 }
 0x160   :  { %2118 = vmatmul.mubr.msk.f32.gmra.mrb[6].mxu1 %vm967_vm4, %v1346_v23 }
 0x161   :  { %2120 = vmatprep.mubr.msk.f32.mxu1 %vm2262_vm2, %v2263_v9  ;;  %2189 = vmatpush3.bf16.msra.mxu1 %v2188_v51 }
 0x164   :  { %2121 = vmatmul.mubr.msk.f32.gmra.mrb[8].mxu1 %vm967_vm4, %v1347_v62 }
 0x165   :  { %2155 = vmatprep.mubr.msk.f32.mxu1 %vm2262_vm2, %v2263_v9 }
 0x224   :  { %v1531_v49 = vpop.f32.mrb[4].mxu0 }
 0x225   :  { %v2129_v7 = vpop.f32.mrb[5].mxu0  ;;  %v1548_v44 = vcombine.high %v1531_v49, %v1531_v49 }
 0x228   :  { %v1536_v27 = vpop.f32.mrb[6].mxu0 }
 0x229   :  { %v2132_v10 = vpop.f32.mrb[7].mxu0  ;;  %v1549_v46 = vcombine.high %v1536_v27, %v1536_v27 }
 0x22c   :  { %v1541_v47 = vpop.f32.mrb[8].mxu0 }
 0x22d   :  { %v2135_v11 = vpop.f32.mrb[9].mxu0  ;;  %v1550_v38 = vcombine.high %v1541_v47, %v1541_v47 }
 0x22f   :  { %v1420_v43 = vpop.f32.mrb[4].mxu1 }
 0x230   :  { %v1437_v45 = vcombine.high %v1420_v43, %v1420_v43  ;;  %v1554_v48 = vadd.f32 %v1531_v49, %v1420_v43  ;;  %v2116_v18 = vpop.f32.mrb[5].mxu1 }
 0x232   :  { %v1555_v55 = vadd.f32 %v1548_v44, %v1437_v45  ;;  %v1585_v33 = vmul.f32 %v1554_v48, %v1554_v48 }
 0x233   :  { %v1425_v12 = vpop.f32.mrb[6].mxu1 }
 0x234   :  { %v1564_v13 = vcombine.low %v1554_v48, %v1555_v55  ;;  %v1586_v14 = vmul.f32 %v1555_v55, %v1555_v55  ;;  %v1438_v15 = vcombine.high %v1425_v12, %v1425_v12  ;;  %v1556_v19 = vadd.f32 %v1536_v27, %v1425_v12  ;;  %v2119_v20 = vpop.f32.mrb[7].mxu1 }
 0x236   :  { %v1569_v24 = vsel %vm1568_vm5, %v1564_v13, 0.0  ;;  %v1595_v16 = vcombine.low %v1585_v33, %v1586_v14  ;;  %1623 = vst.msk [vmem:[#allocation3] sm:$0xff] %vm1568_vm5, %v1564_v13  ;;  %v1557_v25 = vadd.f32 %v1549_v46, %v1438_v15  ;;  %v1571_v26 = vsel %vm1570_vm6, %v1556_v19, 0.0 }
 0x237   :  { %1624 = vst.msk [vmem:[#allocation3 + $0x8] sm:$0xf] %vm1570_vm6, %v1556_v19  ;;  %v1572_v34 = vadd.f32 %v1571_v26, %v1569_v24  ;;  %v1587_v36 = vmul.f32 %v1556_v19, %v1556_v19  ;;  %v1430_v37 = vpop.f32.mrb[8].mxu1 }
 0x238   :  { %v1599_v21 = vsel %vm1568_vm5, %v1595_v16, 0.0  ;;  %v1439_v29 = vcombine.high %v1430_v37, %v1430_v37  ;;  %v1558_v40 = vadd.f32 %v1541_v47, %v1430_v37  ;;  %v2122_v42 = vpop.f32.mrb[9].mxu1  ;;  %v1588_v35 = vmul.f32 %v1557_v25, %v1557_v25 }
 0x239   :  { %v1600_v17 = vsel %vm1570_vm6, %v1587_v36, 0.0 }
 0x23a   :  { %v1601_v50 = vadd.f32 %v1600_v17, %v1599_v21  ;;  %v1559_v52 = vadd.f32 %v1550_v38, %v1439_v29  ;;  %v1565_v53 = vcombine.low %v1557_v25, %v1558_v40  ;;  %v1589_v39 = vmul.f32 %v1558_v40, %v1558_v40 }
 0x23c   :  { %v1573_v22 = vsel %vm1568_vm5, %v1565_v53, 0.0  ;;  %v1590_v30 = vmul.f32 %v1559_v52, %v1559_v52  ;;  %v1596_v56 = vcombine.low %v1588_v35, %v1589_v39  ;;  %1625 = vst.msk [vmem:[#allocation3 + $0x10] sm:$0xff] %vm1568_vm5, %v1565_v53  ;;  %v1575_v58 = vsel %vm1570_vm6, %v1559_v52, 0.0 }
 0x23d   :  { %1626 = vst.msk [vmem:[#allocation3 + $0x18] sm:$0xf] %vm1570_vm6, %v1559_v52  ;;  %v1574_v57 = vadd.f32 %v1573_v22, %v1572_v34  ;;  %v1627_v8 = vld [vmem:[#allocation3] sm:$0xff] }
 0x23e   :  { %v1602_v59 = vsel %vm1568_vm5, %v1596_v56, 0.0  ;;  %v1604_v31 = vsel %vm1570_vm6, %v1590_v30, 0.0  ;;  %v1669_v63 = vld [vmem:[#allocation3 + $0x1] sm:$0xff]  ;;  %v1670_v0 = vld [vmem:[#allocation3 + $0x9] sm:$0x3]  ;;  %v1631_v45 = vsel %vm1568_vm5, %v1627_v8, 0.0 }
 0x23f   :  { %v1576_v60 = vadd.f32 %v1575_v58, %v1574_v57  ;;  %v1603_v23 = vadd.f32 %v1602_v59, %v1601_v50  ;;  %v1628_v4 = vld [vmem:[#allocation3 + $0x8] sm:$0x3]  ;;  %v1673_v6 = vsel %vm1568_vm5, %v1669_v63, 0.0  ;;  %v1674_v41 = vsel %vm1632_vm7, %v1670_v0, 0.0  ;;  %v1856_v10 = vld [vmem:[#allocation3 + $0xa] sm:$0x3] }
 0x240   :  { %v1855_v49 = vld [vmem:[#allocation3 + $0x2] sm:$0xff]  ;;  %v1633_v48 = vsel %vm1632_vm7, %v1628_v4, 0.0  ;;  %v1860_v13 = vsel %vm1632_vm7, %v1856_v10, 0.0  ;;  %v1675_v24 = vadd.f32 %v1674_v41, %v1673_v6 }
 0x241   :  { %v1577_v61 = vrot.slane %v1576_v60, 4  ;;  %v1605_v62 = vadd.f32 %v1604_v31, %v1603_v23  ;;  %v1859_v12 = vsel %vm1568_vm5, %v1855_v49, 0.0  ;;  %v1634_v25 = vadd.f32 %v1633_v48, %v1631_v45 }
 0x242   :  { %v1861_v37 = vadd.f32 %v1860_v13, %v1859_v12  ;;  %v1676_v40 = vrot.slane %v1675_v24, 4 }
 0x243   :  { %v1578_v1 = vadd.f32 %v1577_v61, %v1576_v60  ;;  %v1606_v28 = vrot.slane %v1605_v62, 4  ;;  %v1629_v5 = vld [vmem:[#allocation3 + $0x10] sm:$0xff]  ;;  %v1635_v35 = vrot.slane %v1634_v25, 4 }
 0x244   :  { %v1671_v32 = vld [vmem:[#allocation3 + $0x11] sm:$0xff]  ;;  %v1672_v2 = vld [vmem:[#allocation3 + $0x19] sm:$0x3]  ;;  %v1641_v46 = vsel %vm1568_vm5, %v1629_v5, 0.0  ;;  %v1862_v53 = vrot.slane %v1861_v37, 4  ;;  %v1677_v30 = vadd.f32 %v1676_v40, %v1675_v24 }
 0x245   :  { %v1630_v51 = vld [vmem:[#allocation3 + $0x18] sm:$0x3]  ;;  %v1579_v7 = vrot.slane %v1578_v1, 2  ;;  %v1607_v27 = vadd.f32 %v1606_v28, %v1605_v62  ;;  %v1858_v11 = vld [vmem:[#allocation3 + $0x1a] sm:$0x3]  ;;  %v1682_v43 = vsel %vm1568_vm5, %v1671_v32, 0.0  ;;  %v1636_v57 = vadd.f32 %v1635_v35, %v1634_v25 }
 0x246   :  { %v1857_v47 = vld [vmem:[#allocation3 + $0x12] sm:$0xff]  ;;  %v1683_v44 = vsel %vm1632_vm7, %v1672_v2, 0.0  ;;  %v1642_v33 = vsel %vm1632_vm7, %v1630_v51, 0.0  ;;  %v1869_v15 = vsel %vm1632_vm7, %v1858_v11, 0.0  ;;  %v1863_v60 = vadd.f32 %v1862_v53, %v1861_v37 }
 0x247   :  { %v1580_v18 = vadd.f32 %v1579_v7, %v1578_v1  ;;  %v1608_v55 = vrot.slane %v1607_v27, 2  ;;  %v1868_v14 = vsel %vm1568_vm5, %v1857_v47, 0.0  ;;  %v1684_v16 = vadd.f32 %v1683_v44, %v1682_v43 }
 0x248   :  { %v1643_v26 = vadd.f32 %v1642_v33, %v1641_v46  ;;  %v1870_v38 = vadd.f32 %v1869_v15, %v1868_v14  ;;  %v1678_v61 = vrot.slane %v1677_v30, 2  ;;  %v1637_v63 = vrot.slane %v1636_v57, 2 }
 0x249   :  { %v1581_v19 = vrot.slane %v1580_v18, 1  ;;  %v1609_v20 = vadd.f32 %v1608_v55, %v1607_v27  ;;  %v1685_v42 = vrot.slane %v1684_v16, 4  ;;  %v1864_v8 = vrot.slane %v1863_v60, 2  ;;  %v1616_v27 = vld [vmem:[%s2748_s4 + $0x1] sm:$0x1] }
 0x24a   :  { %v1644_v17 = vrot.slane %v1643_v26, 4  ;;  %v1871_v39 = vrot.slane %v1870_v38, 4  ;;  %v1679_v28 = vadd.f32 %v1678_v61, %v1677_v30  ;;  %v1638_v2 = vadd.f32 %v1637_v63, %v1636_v57  ;;  %v1620_v55 = vld [vmem:[%s2748_s4 + $0x2] sm:$0x1]  ;;  %v2025_v57 = vld [vmem:[%s2747_s3 + $0x58] sm:$0xff] }
 0x24b   :  { %v1582_v34 = vadd.f32 %v1581_v19, %v1580_v18  ;;  %v1610_v36 = vrot.slane %v1609_v20, 1  ;;  %v1686_v56 = vadd.f32 %v1685_v42, %v1684_v16  ;;  %v1865_v6 = vadd.f32 %v1864_v8, %v1863_v60 }
 0x24c   :  { %v1645_v58 = vadd.f32 %v1644_v17, %v1643_v26  ;;  %v1872_v23 = vadd.f32 %v1871_v39, %v1870_v38  ;;  %v1680_v5 = vrot.slane %v1679_v28, 1  ;;  %v1639_v49 = vrot.slane %v1638_v2, 1 }
 0x24d   :  { %v1584_v21 = vmul.f32 0.041666668, %v1582_v34  ;;  %v1611_v29 = vadd.f32 %v1610_v36, %v1609_v20  ;;  %v1687_v62 = vrot.slane %v1686_v56, 2  ;;  %v1866_v10 = vrot.slane %v1865_v6, 1 }
 0x24e   :  { %v1646_v0 = vrot.slane %v1645_v58, 2  ;;  %v1873_v1 = vrot.slane %v1872_v23, 2  ;;  %v1681_v43 = vadd.f32 %v1680_v5, %v1679_v28  ;;  %v1640_v48 = vadd.f32 %v1639_v49, %v1638_v2  ;;  %v2027_v28 = vld [vmem:[%s2748_s4 + $0x3] ss:$0 sm:$0xff] }
 0x24f   :  { %v1612_v50 = vmul.f32 0.041666668, %v1611_v29  ;;  %v1613_v52 = vmul.f32 %v1584_v21, %v1584_v21  ;;  %v1688_v32 = vadd.f32 %v1687_v62, %v1686_v56  ;;  %v1867_v46 = vadd.f32 %v1866_v10, %v1865_v6  ;;  %v2022_v29 = vld [vmem:[%s2747_s3 + $0x40] sm:$0xff]  ;;  %v2024_v56 = vld [vmem:[%s2747_s3 + $0x50] sm:$0xff] }
 0x250   :  { %v1647_v4 = vadd.f32 %v1646_v0, %v1645_v58  ;;  %v1874_v41 = vadd.f32 %v1873_v1, %v1872_v23  ;;  %v1691_v14 = vmul.f32 0.1, %v1681_v43  ;;  %v1651_v20 = vmul.f32 0.1, %v1640_v48 }
 0x251   :  { %v1614_v22 = vsub.f32 %v1612_v50, %v1613_v52  ;;  %v1689_v51 = vrot.slane %v1688_v32, 1  ;;  %v1877_v25 = vmul.f32 0.1, %v1867_v46 }
 0x252   :  { %v1648_v7 = vrot.slane %v1647_v4, 1  ;;  %v1875_v47 = vrot.slane %v1874_v41, 1 }
 0x253   :  { %v1615_v59 = vmax.f32 %v1614_v22, 0.0  ;;  %v1690_v45 = vadd.f32 %v1689_v51, %v1688_v32 }
 0x254   :  { %v1649_v18 = vadd.f32 %v1648_v7, %v1647_v4  ;;  %v1876_v33 = vadd.f32 %v1875_v47, %v1874_v41 }
 0x255   :  { %v1617_v31 = vadd.f32 1e-05, %v1615_v59  ;;  %v1692_v19 = vmul.f32 0.1, %v1690_v45 }
 0x256   :  { %v1652_v24 = vmul.f32 0.1, %v1649_v18  ;;  %v1878_v26 = vmul.f32 0.1, %v1876_v33 }
 0x257   :  { %2234 = vrsqrt.f32 %v1617_v31  ;;  %v2194_v31 = vpack.c.bf16 %v2025_v57, %v2024_v56 }
 0x261   :  { %v2235_v11 = vpop.eup %2234 }
 0x262   :  { %v1619_v44 = vmul.f32 %v2235_v11, %v1616_v27 }
 0x264   :  { %v1621_v12 = vmul.f32 %v1619_v44, %v1584_v21  ;;  %v1656_v13 = vrot.slane %v1619_v44, %v2586_v54  ;;  %v2023_v21 = vld [vmem:[%s2747_s3 + $0x48] sm:$0xff] }
 0x265   :  { %v2191_v30 = vpack.c.bf16 %v2023_v21, %v2022_v29 }
 0x266   :  { %v1622_v15 = vsub.f32 %v1620_v55, %v1621_v12  ;;  %v1693_v16 = vmul.f32 %v1691_v14, %v1656_v13  ;;  %v1694_v36 = vmul.f32 %v1692_v19, %v1656_v13  ;;  %v1657_v37 = vmul.f32 %v1656_v13, %v1651_v20 }
 0x267   :  { %v1658_v38 = vmul.f32 %v1656_v13, %v1652_v24  ;;  %v1879_v40 = vmul.f32 %v1877_v25, %v1656_v13  ;;  %v1880_v42 = vmul.f32 %v1878_v26, %v1656_v13 }
 0x268   :  { %v1662_v34 = vrot.slane %v1622_v15, %v2586_v54 }
 0x26a   :  { %v1695_v35 = vadd.f32 %v1693_v16, %v1662_v34  ;;  %v1696_v17 = vadd.f32 %v1694_v36, %v1662_v34  ;;  %v1663_v50 = vadd.f32 %v1662_v34, %v1657_v37  ;;  %v1664_v52 = vadd.f32 %v1662_v34, %v1658_v38 }
 0x26b   :  { %v1881_v53 = vadd.f32 %v1879_v40, %v1662_v34  ;;  %v1882_v54 = vadd.f32 %v1880_v42, %v1662_v34 }
 0x26c   :  { %v1704_v39 = vrot.slane %v1696_v17, 7  ;;  %v1781_v22 = vrot.slane %v1664_v52, 7 }
 0x26d   :  { %v1890_v58 = vrot.slane %v1882_v54, 7 }
 0x26e   :  { %v1706_v59 = vsel %vm1705_vm8, %v1704_v39, %v1695_v35  ;;  %v1782_v60 = vsel %vm1705_vm8, %v1781_v22, %v1663_v50 }
 0x26f   :  { %2145 = vmatmul.mubr.msk.f32.vlgmr.msra.gmra.mrb[10].mxu0 %vm1568_vm5, %v1706_v59  ;;  %2156 = vmatmul.mubr.msk.f32.vlgmr.msra.gmra.mrb[10].mxu1 %vm1568_vm5, %v1782_v60  ;;  %v1891_v23 = vsel %vm1705_vm8, %v1890_v58, %v1881_v53 }
 0x270   :  { %2192 = vmatpush3.bf16.msra.mxu0 %v2191_v30  ;;  %2166 = vmatprep.mubr.msk.f32.mxu0 %vm2262_vm2, %v2263_v9 }
 0x271   :  { %2193 = vmatprep.subr.bf16.mxu0 %v2261_v3 }
 0x274   :  { %2195 = vmatpush3.bf16.msra.mxu0 %v2194_v31 }
 0x277   :  { %2167 = vmatmul.mubr.msk.f32.vlgmr.msra.gmra.mrb[12].mxu0 %vm1568_vm5, %v1891_v23 }
 0x342   :  { %v1775_v61 = vpop.f32.mrb[10].mxu0  ;;  %v1851_v62 = vpop.f32.mrb[10].mxu1 }
 0x343   :  { %v1852_v63 = vadd.f32 %v1851_v62, %v1775_v61  ;;  %v2146_v0 = vpop.f32.mrb[11].mxu0  ;;  %v2157_v8 = vpop.f32.mrb[11].mxu1 }
 0x34a   :  { %v1960_v1 = vpop.f32.mrb[12].mxu0 }
 0x34b   :  { %v1964_v32 = vadd.f32 %v1960_v1, %v1852_v63  ;;  %v2168_v2 = vpop.f32.mrb[13].mxu0 }
 0x34d   :  { %v1970_v9 = vadd.f32 %v2027_v28, %v1964_v32 }
 0x34f   :  { %1971 = vst.msk [vmem:[#allocation4] sm:$0x3] %vm1632_vm7, %v1970_v9 }
 0x350   :  { %2247 = shalt.err (!%p2244_p4)
}
 0x351   :  { %s2248_s14 = scalar_lea.hbm %s2749_s5, 32 }
 0x352   :  { %p2249_p5 = scmp.ne.s32.totalorder %s2749_s5, %s2248_s14  ;;  %p2252_p6 = scmp.lt.u32.totalorder %s2248_s14, %s2749_s5 }
 0x354   :  { %p2254_p7 = pnand %p2252_p6, %p2249_p5 }
 0x356   :  { %2257 = shalt.err (!%p2254_p7)
}
 0x357   :  { %1981 = dma.vmem_to_hbm [thread:$0]  %s1979_s11, 32, %s2749_s5, [#allocation5]  }
 0x358   :  { %2258 = dma.done.wait [#allocation5], 32  }
 0x359   :  { %2259 = vsyncadd [#allocation5], 4294967264 }
 0x35a   :  { %1985 = vsyncpa [#allocation5], 1 }

</bundles_post_ra>
